<compile_context>
chip_gen: v7x
topology: tpu7x:2x2x1
jax: 0.10.0
libtpu: 0.0.40
codegen_flags: <defaults>
</compile_context>

<pallas_src>
import functools

import jax
import jax.numpy as jnp
from jax import lax
from jax.experimental import pallas as pl
from jax.experimental.pallas import tpu as pltpu


_VMEM_LIMIT = 48 * 1024 * 1024  # safe on v5e/v6e (128 MiB) and v7x (64 MiB/TC)


# ----------------------------------------------------------------------------
# Tiling helpers
# ----------------------------------------------------------------------------
def _divisor_tile(dim, desired, quantum):
    """Largest quantum-multiple tile <= desired dividing dim, else the full dim."""
    if dim <= desired:
        return dim
    t = (desired // quantum) * quantum
    while t >= quantum:
        if dim % t == 0:
            return t
        t -= quantum
    return dim


def _padded_tile(dim, desired, quantum):
    """(tile, padded_dim) for an axis we may zero-pad (the row / B*S axis)."""
    if dim <= desired:
        return dim, dim
    t = (desired // quantum) * quantum
    cand = t
    while cand >= quantum:
        if dim % cand == 0:
            return cand, dim
        cand -= quantum
    padded = ((dim + t - 1) // t) * t          # pad instead of whole-dim block
    return t, padded


def _heads_per_block(n_heads, d_head, target_lanes=256):
    """Heads per attention grid step (keep lane width a 128-multiple when possible)."""
    if n_heads * d_head <= target_lanes:
        return n_heads
    for hb in range(n_heads, 0, -1):
        if n_heads % hb == 0 and (hb * d_head) % 128 == 0 and hb * d_head <= target_lanes:
            return hb
    return n_heads


# ----------------------------------------------------------------------------
# Kernels
# ----------------------------------------------------------------------------
def _dense_kernel(x_ref, w_ref, b_ref, o_ref, *, activation):
    # bf16 operands into the MXU, f32 accumulation.
    h = jnp.dot(x_ref[...], w_ref[...], preferred_element_type=jnp.float32)
    h = h + b_ref[...].astype(jnp.float32)
    if activation == "gelu":
        # tanh-approx GELU (original BERT gelu); exact-erf differs by ~1e-3.
        c = jnp.float32(0.7978845608028654)  # sqrt(2/pi)
        h = 0.5 * h * (1.0 + jnp.tanh(c * (h + 0.044715 * h * h * h)))
    o_ref[...] = h.astype(o_ref.dtype)


def _dense_add_ln_kernel(x_ref, w_ref, b_ref, r_ref, g_ref, bt_ref, o_ref, *, eps):
    # Fused LN(residual + x @ w + b): removes an HBM round trip of the activation.
    h = jnp.dot(x_ref[...], w_ref[...], preferred_element_type=jnp.float32)
    z = h + b_ref[...].astype(jnp.float32) + r_ref[...].astype(jnp.float32)
    mu = jnp.mean(z, axis=-1, keepdims=True)
    var = jnp.mean(jnp.square(z - mu), axis=-1, keepdims=True)
    zn = (z - mu) * lax.rsqrt(var + eps)
    o_ref[...] = (zn * g_ref[...].astype(jnp.float32)
                  + bt_ref[...].astype(jnp.float32)).astype(o_ref.dtype)


def _attn_kernel(q_ref, k_ref, v_ref, m_ref, o_ref, *, scale, hb, dh):
    """q/k/v refs: (1, S, hb*dh) bf16 blocks; m_ref: (1, 1, S) f32 additive mask."""
    m = m_ref[0]                                          # (1, S)
    outs = []
    for h in range(hb):                                   # static unrolled head loop
        sl = slice(h * dh, (h + 1) * dh)
        q = q_ref[0, :, sl]                               # (S, Dh) bf16
        k = k_ref[0, :, sl]
        v = v_ref[0, :, sl]
        # Contract last dims directly (no explicit k transpose); f32 scores.
        s = lax.dot_general(q, k, (((1,), (1,)), ((), ())),
                            preferred_element_type=jnp.float32)
        s = s * scale + m                                 # (1,S) key mask broadcast
        s = s - jnp.max(s, axis=-1, keepdims=True)
        p = jnp.exp(s)
        p = p * pl.reciprocal(jnp.sum(p, axis=-1, keepdims=True), approx=True)
        outs.append(jnp.dot(p.astype(v.dtype), v,
                            preferred_element_type=jnp.float32))
    # One lane-dense full-width store for the whole head block (no masked vst).
    o_ref[0] = jnp.concatenate(outs, axis=-1).astype(o_ref.dtype)
    # TODO(synk): add a kv grid axis with online-softmax (flash-style) scratch for
    # long sequences (S >~ 2k) so the S x S score temporaries stay bounded.


# ----------------------------------------------------------------------------
# Pallas wrappers
# ----------------------------------------------------------------------------
def dense(x2d, w, b, activation=None, tile_m=256, tile_n=512):
    """out = act(x2d @ w + b).  x2d: (M, K), w: (K, N), b: (1, N)."""
    M, K = x2d.shape
    N = w.shape[1]
    tm, Mp = _padded_tile(M, tile_m, 8)
    tn = _divisor_tile(N, tile_n, 128)
    if Mp != M:
        x2d = jnp.pad(x2d, ((0, Mp - M), (0, 0)))
    gm, gn = Mp // tm, N // tn

    x_bytes = Mp * K * jnp.dtype(x2d.dtype).itemsize
    w_bytes = K * N * jnp.dtype(w.dtype).itemsize
    # Pick the grid order that streams the LARGER operand exactly once:
    #   rows-outer: x streamed once, W streamed gm times
    #   cols-outer: W streamed once, x streamed gn times
    rows_outer = (x_bytes + w_bytes * gm) <= (w_bytes + x_bytes * gn)
    if rows_outer:
        grid = (gm, gn)
        x_spec = pl.BlockSpec((tm, K), lambda i, j: (i, 0))
        w_spec = pl.BlockSpec((K, tn), lambda i, j: (0, j))
        b_spec = pl.BlockSpec((1, tn), lambda i, j: (0, j))
        o_spec = pl.BlockSpec((tm, tn), lambda i, j: (i, j))
    else:
        grid = (gn, gm)
        x_spec = pl.BlockSpec((tm, K), lambda j, i: (i, 0))
        w_spec = pl.BlockSpec((K, tn), lambda j, i: (0, j))
        b_spec = pl.BlockSpec((1, tn), lambda j, i: (0, j))
        o_spec = pl.BlockSpec((tm, tn), lambda j, i: (i, j))

    out = pl.pallas_call(
        functools.partial(_dense_kernel, activation=activation),
        out_shape=jax.ShapeDtypeStruct((Mp, N), x2d.dtype),
        grid_spec=pltpu.PrefetchScalarGridSpec(
            num_scalar_prefetch=0, grid=grid,
            in_specs=[x_spec, w_spec, b_spec],
            out_specs=o_spec),
        compiler_params=pltpu.CompilerParams(
            dimension_semantics=("parallel", "parallel"),
            vmem_limit_bytes=_VMEM_LIMIT),
    )(x2d, w, b)
    return out[:M] if Mp != M else out


def dense_add_layernorm(x2d, w, b, res2d, gamma, beta, eps=1e-12, tile_m=256):
    """LayerNorm(res2d + x2d @ w + b).  x2d: (M, K), w: (K, N), res2d: (M, N)."""
    M, K = x2d.shape
    N = w.shape[1]
    tm, Mp = _padded_tile(M, tile_m, 8)
    if Mp != M:
        x2d = jnp.pad(x2d, ((0, Mp - M), (0, 0)))
        res2d = jnp.pad(res2d, ((0, Mp - M), (0, 0)))
    out = pl.pallas_call(
        functools.partial(_dense_add_ln_kernel, eps=eps),
        out_shape=jax.ShapeDtypeStruct((Mp, N), res2d.dtype),
        grid_spec=pltpu.PrefetchScalarGridSpec(
            num_scalar_prefetch=0, grid=(Mp // tm,),
            in_specs=[
                pl.BlockSpec((tm, K), lambda i: (i, 0)),
                pl.BlockSpec((K, N), lambda i: (0, 0)),   # constant index: DMA'd once
                pl.BlockSpec((1, N), lambda i: (0, 0)),
                pl.BlockSpec((tm, N), lambda i: (i, 0)),
                pl.BlockSpec((1, N), lambda i: (0, 0)),
                pl.BlockSpec((1, N), lambda i: (0, 0)),
            ],
            out_specs=pl.BlockSpec((tm, N), lambda i: (i, 0))),
        compiler_params=pltpu.CompilerParams(
            dimension_semantics=("parallel",),
            vmem_limit_bytes=_VMEM_LIMIT),
    )(x2d, w, b, res2d, gamma, beta)
    return out[:M] if Mp != M else out


def attention(qkv, add_mask, n_heads):
    """qkv: (B, S, 3D) fused [q | k | v] projections; add_mask: (B, 1, S) f32.

    Returns (B, S, D) with heads already merged (no XLA head split/merge).
    """
    B, S, D3 = qkv.shape
    D = D3 // 3
    Dh = D // n_heads
    Hb = _heads_per_block(n_heads, Dh)
    nblk = n_heads // Hb
    blk = Hb * Dh
    scale = 1.0 / (Dh ** 0.5)

    kernel = functools.partial(_attn_kernel, scale=scale, hb=Hb, dh=Dh)
    m_spec = pl.BlockSpec((1, 1, S), lambda b, j: (b, 0, 0))
    o_spec = pl.BlockSpec((1, S, blk), lambda b, j: (b, 0, j))
    common = dict(
        out_shape=jax.ShapeDtypeStruct((B, S, D), qkv.dtype),
        compiler_params=pltpu.CompilerParams(
            dimension_semantics=("parallel", "parallel"),
            vmem_limit_bytes=_VMEM_LIMIT),
    )

    if blk % 128 == 0:
        # Index the q / k / v lane blocks straight out of the fused qkv array:
        # no XLA slices, no extra (B, S, D) HBM round trips around attention.
        in_specs = [
            pl.BlockSpec((1, S, blk), lambda b, j: (b, 0, j)),
            pl.BlockSpec((1, S, blk), lambda b, j: (b, 0, nblk + j)),
            pl.BlockSpec((1, S, blk), lambda b, j: (b, 0, 2 * nblk + j)),
            m_spec,
        ]
        return pl.pallas_call(
            kernel,
            grid_spec=pltpu.PrefetchScalarGridSpec(
                num_scalar_prefetch=0, grid=(B, nblk),
                in_specs=in_specs, out_specs=o_spec),
            **common,
        )(qkv, qkv, qkv, add_mask)

    # Small-D fallback: lane block would not be 128-aligned inside the fused
    # array, so take contiguous slices (each block then spans its full last dim).
    q = qkv[:, :, :D]
    k = qkv[:, :, D:2 * D]
    v = qkv[:, :, 2 * D:]
    in_specs = [
        pl.BlockSpec((1, S, blk), lambda b, j: (b, 0, j)),
        pl.BlockSpec((1, S, blk), lambda b, j: (b, 0, j)),
        pl.BlockSpec((1, S, blk), lambda b, j: (b, 0, j)),
        m_spec,
    ]
    return pl.pallas_call(
        kernel,
        grid_spec=pltpu.PrefetchScalarGridSpec(
            num_scalar_prefetch=0, grid=(B, nblk),
            in_specs=in_specs, out_specs=o_spec),
        **common,
    )(q, k, v, add_mask)


# ----------------------------------------------------------------------------
# Encoder (glue in plain JAX: only reshapes)
# ----------------------------------------------------------------------------
def encoder_layer(x, add_mask, p, n_heads):
    B, S, D = x.shape
    x2 = x.reshape(B * S, D)

    # Fused QKV projection (one kernel, x read once) fed straight to attention.
    qkv = dense(x2, p["wqkv"], p["bqkv"]).reshape(B, S, 3 * D)
    ctx = attention(qkv, add_mask, n_heads)                     # (B, S, D)
    ctx2 = ctx.reshape(B * S, D)

    # Fused: LN(x + ctx @ Wo + bo)
    h = dense_add_layernorm(ctx2, p["wo"], p["bo"], x2, p["ln1_g"], p["ln1_b"])

    # FFN: Linear -> GELU (fused), then Linear + residual + LN (fused)
    ff1 = dense(h, p["w1"], p["b1"], activation="gelu")
    out = dense_add_layernorm(ff1, p["w2"], p["b2"], h, p["ln2_g"], p["ln2_b"])
    return out.reshape(B, S, D)


def encoder_forward(x, src_mask, layer_params, n_heads):
    """Mirrors `Encoder.forward`: sequentially apply every layer."""
    in_dtype = x.dtype
    # Key-padding mask -> (B, 1, S) additive mask (== masked_fill(mask==0, -1e9)).
    add_mask = jnp.where(src_mask[:, None, :], 0.0, -1e9).astype(jnp.float32)
    # bf16 activations: MXU-native operands, half the HBM traffic.
    x = x.astype(jnp.bfloat16)
    for p in layer_params:
        x = encoder_layer(x, add_mask, p, n_heads)
    return x.astype(in_dtype)


# ----------------------------------------------------------------------------
# Deterministic parameter init (weights bf16, biases / LN params f32)
# ----------------------------------------------------------------------------
def init_layer_params(key, d_model, d_ff):
    ks = jax.random.split(key, 6)
    s = 0.02

    def w(k, shape):
        return (s * jax.random.normal(k, shape, jnp.float32)).astype(jnp.bfloat16)

    wq = w(ks[0], (d_model, d_model))
    wk = w(ks[1], (d_model, d_model))
    wv = w(ks[2], (d_model, d_model))
    return {
        "wqkv": jnp.concatenate([wq, wk, wv], axis=1),          # (D, 3D) bf16
        "bqkv": jnp.zeros((1, 3 * d_model), jnp.float32),
        "wo": w(ks[3], (d_model, d_model)),
        "bo": jnp.zeros((1, d_model), jnp.float32),
        "w1": w(ks[4], (d_model, d_ff)),
        "b1": jnp.zeros((1, d_ff), jnp.float32),
        "w2": w(ks[5], (d_ff, d_model)),
        "b2": jnp.zeros((1, d_model), jnp.float32),
        "ln1_g": jnp.ones((1, d_model), jnp.float32),
        "ln1_b": jnp.zeros((1, d_model), jnp.float32),
        "ln2_g": jnp.ones((1, d_model), jnp.float32),
        "ln2_b": jnp.zeros((1, d_model), jnp.float32),
    }


if __name__ == "__main__":
    B, S, D, H, D_FF, N_LAYERS = 2, 8, 32, 4, 64, 2

    key = jax.random.PRNGKey(0)
    kx, *kl = jax.random.split(key, 1 + N_LAYERS)

    x = jax.random.normal(kx, (B, S, D), jnp.float32)
    # padding mask: batch 0 all valid, batch 1 last two tokens padded
    src_mask = jnp.array(
        [[True] * S,
         [True] * (S - 2) + [False] * 2],
        dtype=jnp.bool_)

    layer_params = [init_layer_params(k, D, D_FF) for k in kl]

    fwd = jax.jit(encoder_forward, static_argnums=3)
    out = fwd(x, src_mask, layer_params, H)
    out = jax.block_until_ready(out)

    assert out.shape == (B, S, D)
    assert bool(jnp.all(jnp.isfinite(out)))
    print("KERNEL_OK")
</pallas_src>

<mosaic_0001>
module attributes {stable_mosaic.version = 11 : i64} {
  func.func @_dense_kernel(%arg0: i32, %arg1: i32, %arg2: memref<16x32xbf16, #tpu.memory_space<vmem>>, %arg3: memref<32x96xbf16, #tpu.memory_space<vmem>>, %arg4: memref<1x96xf32, #tpu.memory_space<vmem>>, %arg5: memref<16x96xbf16, #tpu.memory_space<vmem>>) attributes {dimension_semantics = [#tpu.dimension_semantics<parallel>, #tpu.dimension_semantics<parallel>], iteration_bounds = array<i64: 1, 1>, scalar_prefetch = 0 : i64, scratch_operands = 0 : i64, tpu.core_type = #tpu.core_type<tc>, window_params = [{transform_indices = @transform_0, window_bounds = array<i64: 16, 32>}, {transform_indices = @transform_1, window_bounds = array<i64: 32, 96>}, {transform_indices = @transform_2, window_bounds = array<i64: 1, 96>}, {transform_indices = @transform_3, window_bounds = array<i64: 16, 96>}]} {
    %c0 = arith.constant 0 : index
    %c0_0 = arith.constant 0 : index
    %0 = vector.load %arg2[%c0, %c0_0] : memref<16x32xbf16, #tpu.memory_space<vmem>>, vector<16x32xbf16>
    %c0_1 = arith.constant 0 : index
    %c0_2 = arith.constant 0 : index
    %1 = vector.load %arg3[%c0_1, %c0_2] : memref<32x96xbf16, #tpu.memory_space<vmem>>, vector<32x96xbf16>
    %cst = arith.constant dense<0.000000e+00> : vector<16x96xf32>
    %2 = tpu.matmul %0, %1, %cst {dimension_numbers = #tpu.dot_dimension_numbers<[1], [0], [0], [1], [0, 0, 1, 1], [], []>} : vector<16x32xbf16>, vector<32x96xbf16>, vector<16x96xf32> -> vector<16x96xf32>
    %c0_3 = arith.constant 0 : index
    %c0_4 = arith.constant 0 : index
    %3 = vector.load %arg4[%c0_3, %c0_4] : memref<1x96xf32, #tpu.memory_space<vmem>>, vector<1x96xf32>
    %4 = vector.broadcast %3 : vector<1x96xf32> to vector<16x96xf32>
    %5 = arith.addf %2, %4 : vector<16x96xf32>
    %6 = arith.truncf %5 : vector<16x96xf32> to vector<16x96xbf16>
    %c0_5 = arith.constant 0 : index
    %c0_6 = arith.constant 0 : index
    %7 = vector.load %arg5[%c0_5, %c0_6] : memref<16x96xbf16, #tpu.memory_space<vmem>>, vector<16x96xbf16>
    tpu.vector_store %arg5[%c0_5, %c0_6], %6 {strides = array<i32>} : memref<16x96xbf16, #tpu.memory_space<vmem>>, vector<16x96xbf16>,
    return
  }
  func.func @transform_0(%arg0: i32, %arg1: i32) -> (i32, i32) {
    %c0_i32 = arith.constant 0 : i32
    %c0_i32_0 = arith.constant 0 : i32
    return %arg0, %c0_i32 : i32, i32
  }
  func.func @transform_1(%arg0: i32, %arg1: i32) -> (i32, i32) {
    %c0_i32 = arith.constant 0 : i32
    %c0_i32_0 = arith.constant 0 : i32
    return %c0_i32, %arg1 : i32, i32
  }
  func.func @transform_2(%arg0: i32, %arg1: i32) -> (i32, i32) {
    %c0_i32 = arith.constant 0 : i32
    %c0_i32_0 = arith.constant 0 : i32
    return %c0_i32, %arg1 : i32, i32
  }
  func.func @transform_3(%arg0: i32, %arg1: i32) -> (i32, i32) {
    %c0_i32 = arith.constant 0 : i32
    return %arg0, %arg1 : i32, i32
  }
}

module attributes {stable_mosaic.version = 11 : i64} {
  func.func @_dense_kernel(%arg0: i32, %arg1: i32, %arg2: memref<16x32xbf16, #tpu.memory_space<vmem>>, %arg3: memref<32x64xbf16, #tpu.memory_space<vmem>>, %arg4: memref<1x64xf32, #tpu.memory_space<vmem>>, %arg5: memref<16x64xbf16, #tpu.memory_space<vmem>>) attributes {dimension_semantics = [#tpu.dimension_semantics<parallel>, #tpu.dimension_semantics<parallel>], iteration_bounds = array<i64: 1, 1>, scalar_prefetch = 0 : i64, scratch_operands = 0 : i64, tpu.core_type = #tpu.core_type<tc>, window_params = [{transform_indices = @transform_0, window_bounds = array<i64: 16, 32>}, {transform_indices = @transform_1, window_bounds = array<i64: 32, 64>}, {transform_indices = @transform_2, window_bounds = array<i64: 1, 64>}, {transform_indices = @transform_3, window_bounds = array<i64: 16, 64>}]} {
    %c0 = arith.constant 0 : index
    %c0_0 = arith.constant 0 : index
    %0 = vector.load %arg2[%c0, %c0_0] : memref<16x32xbf16, #tpu.memory_space<vmem>>, vector<16x32xbf16>
    %c0_1 = arith.constant 0 : index
    %c0_2 = arith.constant 0 : index
    %1 = vector.load %arg3[%c0_1, %c0_2] : memref<32x64xbf16, #tpu.memory_space<vmem>>, vector<32x64xbf16>
    %cst = arith.constant dense<0.000000e+00> : vector<16x64xf32>
    %2 = tpu.matmul %0, %1, %cst {dimension_numbers = #tpu.dot_dimension_numbers<[1], [0], [0], [1], [0, 0, 1, 1], [], []>} : vector<16x32xbf16>, vector<32x64xbf16>, vector<16x64xf32> -> vector<16x64xf32>
    %c0_3 = arith.constant 0 : index
    %c0_4 = arith.constant 0 : index
    %3 = vector.load %arg4[%c0_3, %c0_4] : memref<1x64xf32, #tpu.memory_space<vmem>>, vector<1x64xf32>
    %4 = vector.broadcast %3 : vector<1x64xf32> to vector<16x64xf32>
    %5 = arith.addf %2, %4 : vector<16x64xf32>
    %cst_5 = arith.constant 5.000000e-01 : f32
    %6 = vector.broadcast %cst_5 : f32 to vector<16x64xf32>
    %7 = arith.mulf %6, %5 : vector<16x64xf32>
    %cst_6 = arith.constant 4.471500e-02 : f32
    %8 = vector.broadcast %cst_6 : f32 to vector<16x64xf32>
    %9 = arith.mulf %8, %5 : vector<16x64xf32>
    %10 = arith.mulf %9, %5 : vector<16x64xf32>
    %11 = arith.mulf %10, %5 : vector<16x64xf32>
    %12 = arith.addf %5, %11 : vector<16x64xf32>
    %cst_7 = arith.constant 0.797884583 : f32
    %13 = vector.broadcast %cst_7 : f32 to vector<16x64xf32>
    %14 = arith.mulf %13, %12 : vector<16x64xf32>
    %15 = math.tanh %14 : vector<16x64xf32>
    %cst_8 = arith.constant 1.000000e+00 : f32
    %16 = vector.broadcast %cst_8 : f32 to vector<16x64xf32>
    %17 = arith.addf %16, %15 : vector<16x64xf32>
    %18 = arith.mulf %7, %17 : vector<16x64xf32>
    %19 = arith.truncf %18 : vector<16x64xf32> to vector<16x64xbf16>
    %c0_9 = arith.constant 0 : index
    %c0_10 = arith.constant 0 : index
    %20 = vector.load %arg5[%c0_9, %c0_10] : memref<16x64xbf16, #tpu.memory_space<vmem>>, vector<16x64xbf16>
    tpu.vector_store %arg5[%c0_9, %c0_10], %19 {strides = array<i32>} : memref<16x64xbf16, #tpu.memory_space<vmem>>, vector<16x64xbf16>,
    return
  }
  func.func @transform_0(%arg0: i32, %arg1: i32) -> (i32, i32) {
    %c0_i32 = arith.constant 0 : i32
    %c0_i32_0 = arith.constant 0 : i32
    return %arg0, %c0_i32 : i32, i32
  }
  func.func @transform_1(%arg0: i32, %arg1: i32) -> (i32, i32) {
    %c0_i32 = arith.constant 0 : i32
    %c0_i32_0 = arith.constant 0 : i32
    return %c0_i32, %arg1 : i32, i32
  }
  func.func @transform_2(%arg0: i32, %arg1: i32) -> (i32, i32) {
    %c0_i32 = arith.constant 0 : i32
    %c0_i32_0 = arith.constant 0 : i32
    return %c0_i32, %arg1 : i32, i32
  }
  func.func @transform_3(%arg0: i32, %arg1: i32) -> (i32, i32) {
    %c0_i32 = arith.constant 0 : i32
    return %arg0, %arg1 : i32, i32
  }
}

module attributes {stable_mosaic.version = 11 : i64} {
  func.func @_attn_kernel(%arg0: i32, %arg1: i32, %arg2: memref<1x8x32xbf16, #tpu.memory_space<vmem>>, %arg3: memref<1x8x32xbf16, #tpu.memory_space<vmem>>, %arg4: memref<1x8x32xbf16, #tpu.memory_space<vmem>>, %arg5: memref<1x1x8xf32, #tpu.memory_space<vmem>>, %arg6: memref<1x8x32xbf16, #tpu.memory_space<vmem>>) attributes {dimension_semantics = [#tpu.dimension_semantics<parallel>, #tpu.dimension_semantics<parallel>], iteration_bounds = array<i64: 2, 1>, scalar_prefetch = 0 : i64, scratch_operands = 0 : i64, tpu.core_type = #tpu.core_type<tc>, window_params = [{transform_indices = @transform_0, window_bounds = array<i64: 1, 8, 32>}, {transform_indices = @transform_1, window_bounds = array<i64: 1, 8, 32>}, {transform_indices = @transform_2, window_bounds = array<i64: 1, 8, 32>}, {transform_indices = @transform_3, window_bounds = array<i64: 1, 1, 8>}, {transform_indices = @transform_4, window_bounds = array<i64: 1, 8, 32>}]} {
    %c0 = arith.constant 0 : index
    %c0_0 = arith.constant 0 : index
    %c0_1 = arith.constant 0 : index
    %0 = vector.load %arg5[%c0, %c0_0, %c0_1] : memref<1x1x8xf32, #tpu.memory_space<vmem>>, vector<1x1x8xf32>
    %1 = vector.shape_cast %0 : vector<1x1x8xf32> to vector<1x8xf32>
    %c0_2 = arith.constant 0 : index
    %c0_3 = arith.constant 0 : index
    %c0_4 = arith.constant 0 : index
    %2 = vector.load %arg2[%c0_2, %c0_3, %c0_4] : memref<1x8x32xbf16, #tpu.memory_space<vmem>>, vector<1x8x8xbf16>
    %3 = vector.shape_cast %2 : vector<1x8x8xbf16> to vector<8x8xbf16>
    %c0_5 = arith.constant 0 : index
    %c0_6 = arith.constant 0 : index
    %c0_7 = arith.constant 0 : index
    %4 = vector.load %arg3[%c0_5, %c0_6, %c0_7] : memref<1x8x32xbf16, #tpu.memory_space<vmem>>, vector<1x8x8xbf16>
    %5 = vector.shape_cast %4 : vector<1x8x8xbf16> to vector<8x8xbf16>
    %c0_8 = arith.constant 0 : index
    %c0_9 = arith.constant 0 : index
    %c0_10 = arith.constant 0 : index
    %6 = vector.load %arg4[%c0_8, %c0_9, %c0_10] : memref<1x8x32xbf16, #tpu.memory_space<vmem>>, vector<1x8x8xbf16>
    %7 = vector.shape_cast %6 : vector<1x8x8xbf16> to vector<8x8xbf16>
    %cst = arith.constant dense<0.000000e+00> : vector<8x8xf32>
    %8 = tpu.matmul %3, %5, %cst {dimension_numbers = #tpu.dot_dimension_numbers<[1], [1], [0], [0], [0, 0, 1, 0], [], []>} : vector<8x8xbf16>, vector<8x8xbf16>, vector<8x8xf32> -> vector<8x8xf32>
    %cst_11 = arith.constant 0.353553385 : f32
    %9 = vector.broadcast %cst_11 : f32 to vector<8x8xf32>
    %10 = arith.mulf %8, %9 : vector<8x8xf32>
    %11 = vector.broadcast %1 : vector<1x8xf32> to vector<8x8xf32>
    %12 = arith.addf %10, %11 : vector<8x8xf32>
    %cst_12 = arith.constant dense<0xFF800000> : vector<8xf32>
    %13 = vector.multi_reduction <maximumf>, %12, %cst_12 [1] : vector<8x8xf32> to vector<8xf32>
    %14 = vector.shape_cast %13 : vector<8xf32> to vector<8x1xf32>
    %15 = vector.broadcast %14 : vector<8x1xf32> to vector<8x8xf32>
    %16 = arith.subf %12, %15 : vector<8x8xf32>
    %17 = math.exp %16 : vector<8x8xf32>
    %cst_13 = arith.constant dense<0.000000e+00> : vector<8xf32>
    %18 = vector.multi_reduction <add>, %17, %cst_13 [1] : vector<8x8xf32> to vector<8xf32>
    %19 = vector.shape_cast %18 : vector<8xf32> to vector<8x1xf32>
    %20 = tpu.reciprocal %19 {approx = true} : vector<8x1xf32> -> vector<8x1xf32>
    %21 = vector.broadcast %20 : vector<8x1xf32> to vector<8x8xf32>
    %22 = arith.mulf %17, %21 : vector<8x8xf32>
    %23 = arith.truncf %22 : vector<8x8xf32> to vector<8x8xbf16>
    %cst_14 = arith.constant dense<0.000000e+00> : vector<8x8xf32>
    %24 = tpu.matmul %23, %7, %cst_14 {dimension_numbers = #tpu.dot_dimension_numbers<[1], [0], [0], [1], [0, 0, 1, 1], [], []>} : vector<8x8xbf16>, vector<8x8xbf16>, vector<8x8xf32> -> vector<8x8xf32>
    %c0_15 = arith.constant 0 : index
    %c0_16 = arith.constant 0 : index
    %c8 = arith.constant 8 : index
    %25 = vector.load %arg2[%c0_15, %c0_16, %c8] : memref<1x8x32xbf16, #tpu.memory_space<vmem>>, vector<1x8x8xbf16>
    %26 = vector.shape_cast %25 : vector<1x8x8xbf16> to vector<8x8xbf16>
    %c0_17 = arith.constant 0 : index
    %c0_18 = arith.constant 0 : index
    %c8_19 = arith.constant 8 : index
    %27 = vector.load %arg3[%c0_17, %c0_18, %c8_19] : memref<1x8x32xbf16, #tpu.memory_space<vmem>>, vector<1x8x8xbf16>
    %28 = vector.shape_cast %27 : vector<1x8x8xbf16> to vector<8x8xbf16>
    %c0_20 = arith.constant 0 : index
    %c0_21 = arith.constant 0 : index
    %c8_22 = arith.constant 8 : index
    %29 = vector.load %arg4[%c0_20, %c0_21, %c8_22] : memref<1x8x32xbf16, #tpu.memory_space<vmem>>, vector<1x8x8xbf16>
    %30 = vector.shape_cast %29 : vector<1x8x8xbf16> to vector<8x8xbf16>
    %cst_23 = arith.constant dense<0.000000e+00> : vector<8x8xf32>
    %31 = tpu.matmul %26, %28, %cst_23 {dimension_numbers = #tpu.dot_dimension_numbers<[1], [1], [0], [0], [0, 0, 1, 0], [], []>} : vector<8x8xbf16>, vector<8x8xbf16>, vector<8x8xf32> -> vector<8x8xf32>
    %cst_24 = arith.constant 0.353553385 : f32
    %32 = vector.broadcast %cst_24 : f32 to vector<8x8xf32>
    %33 = arith.mulf %31, %32 : vector<8x8xf32>
    %34 = vector.broadcast %1 : vector<1x8xf32> to vector<8x8xf32>
    %35 = arith.addf %33, %34 : vector<8x8xf32>
    %cst_25 = arith.constant dense<0xFF800000> : vector<8xf32>
    %36 = vector.multi_reduction <maximumf>, %35, %cst_25 [1] : vector<8x8xf32> to vector<8xf32>
    %37 = vector.shape_cast %36 : vector<8xf32> to vector<8x1xf32>
    %38 = vector.broadcast %37 : vector<8x1xf32> to vector<8x8xf32>
    %39 = arith.subf %35, %38 : vector<8x8xf32>
    %40 = math.exp %39 : vector<8x8xf32>
    %cst_26 = arith.constant dense<0.000000e+00> : vector<8xf32>
    %41 = vector.multi_reduction <add>, %40, %cst_26 [1] : vector<8x8xf32> to vector<8xf32>
    %42 = vector.shape_cast %41 : vector<8xf32> to vector<8x1xf32>
    %43 = tpu.reciprocal %42 {approx = true} : vector<8x1xf32> -> vector<8x1xf32>
    %44 = vector.broadcast %43 : vector<8x1xf32> to vector<8x8xf32>
    %45 = arith.mulf %40, %44 : vector<8x8xf32>
    %46 = arith.truncf %45 : vector<8x8xf32> to vector<8x8xbf16>
    %cst_27 = arith.constant dense<0.000000e+00> : vector<8x8xf32>
    %47 = tpu.matmul %46, %30, %cst_27 {dimension_numbers = #tpu.dot_dimension_numbers<[1], [0], [0], [1], [0, 0, 1, 1], [], []>} : vector<8x8xbf16>, vector<8x8xbf16>, vector<8x8xf32> -> vector<8x8xf32>
    %c0_28 = arith.constant 0 : index
    %c0_29 = arith.constant 0 : index
    %c16 = arith.constant 16 : index
    %48 = vector.load %arg2[%c0_28, %c0_29, %c16] : memref<1x8x32xbf16, #tpu.memory_space<vmem>>, vector<1x8x8xbf16>
    %49 = vector.shape_cast %48 : vector<1x8x8xbf16> to vector<8x8xbf16>
    %c0_30 = arith.constant 0 : index
    %c0_31 = arith.constant 0 : index
    %c16_32 = arith.constant 16 : index
    %50 = vector.load %arg3[%c0_30, %c0_31, %c16_32] : memref<1x8x32xbf16, #tpu.memory_space<vmem>>, vector<1x8x8xbf16>
    %51 = vector.shape_cast %50 : vector<1x8x8xbf16> to vector<8x8xbf16>
    %c0_33 = arith.constant 0 : index
    %c0_34 = arith.constant 0 : index
    %c16_35 = arith.constant 16 : index
    %52 = vector.load %arg4[%c0_33, %c0_34, %c16_35] : memref<1x8x32xbf16, #tpu.memory_space<vmem>>, vector<1x8x8xbf16>
    %53 = vector.shape_cast %52 : vector<1x8x8xbf16> to vector<8x8xbf16>
    %cst_36 = arith.constant dense<0.000000e+00> : vector<8x8xf32>
    %54 = tpu.matmul %49, %51, %cst_36 {dimension_numbers = #tpu.dot_dimension_numbers<[1], [1], [0], [0], [0, 0, 1, 0], [], []>} : vector<8x8xbf16>, vector<8x8xbf16>, vector<8x8xf32> -> vector<8x8xf32>
    %cst_37 = arith.constant 0.353553385 : f32
    %55 = vector.broadcast %cst_37 : f32 to vector<8x8xf32>
    %56 = arith.mulf %54, %55 : vector<8x8xf32>
    %57 = vector.broadcast %1 : vector<1x8xf32> to vector<8x8xf32>
    %58 = arith.addf %56, %57 : vector<8x8xf32>
    %cst_38 = arith.constant dense<0xFF800000> : vector<8xf32>
    %59 = vector.multi_reduction <maximumf>, %58, %cst_38 [1] : vector<8x8xf32> to vector<8xf32>
    %60 = vector.shape_cast %59 : vector<8xf32> to vector<8x1xf32>
    %61 = vector.broadcast %60 : vector<8x1xf32> to vector<8x8xf32>
    %62 = arith.subf %58, %61 : vector<8x8xf32>
    %63 = math.exp %62 : vector<8x8xf32>
    %cst_39 = arith.constant dense<0.000000e+00> : vector<8xf32>
    %64 = vector.multi_reduction <add>, %63, %cst_39 [1] : vector<8x8xf32> to vector<8xf32>
    %65 = vector.shape_cast %64 : vector<8xf32> to vector<8x1xf32>
    %66 = tpu.reciprocal %65 {approx = true} : vector<8x1xf32> -> vector<8x1xf32>
    %67 = vector.broadcast %66 : vector<8x1xf32> to vector<8x8xf32>
    %68 = arith.mulf %63, %67 : vector<8x8xf32>
    %69 = arith.truncf %68 : vector<8x8xf32> to vector<8x8xbf16>
    %cst_40 = arith.constant dense<0.000000e+00> : vector<8x8xf32>
    %70 = tpu.matmul %69, %53, %cst_40 {dimension_numbers = #tpu.dot_dimension_numbers<[1], [0], [0], [1], [0, 0, 1, 1], [], []>} : vector<8x8xbf16>, vector<8x8xbf16>, vector<8x8xf32> -> vector<8x8xf32>
    %c0_41 = arith.constant 0 : index
    %c0_42 = arith.constant 0 : index
    %c24 = arith.constant 24 : index
    %71 = vector.load %arg2[%c0_41, %c0_42, %c24] : memref<1x8x32xbf16, #tpu.memory_space<vmem>>, vector<1x8x8xbf16>
    %72 = vector.shape_cast %71 : vector<1x8x8xbf16> to vector<8x8xbf16>
    %c0_43 = arith.constant 0 : index
    %c0_44 = arith.constant 0 : index
    %c24_45 = arith.constant 24 : index
    %73 = vector.load %arg3[%c0_43, %c0_44, %c24_45] : memref<1x8x32xbf16, #tpu.memory_space<vmem>>, vector<1x8x8xbf16>
    %74 = vector.shape_cast %73 : vector<1x8x8xbf16> to vector<8x8xbf16>
    %c0_46 = arith.constant 0 : index
    %c0_47 = arith.constant 0 : index
    %c24_48 = arith.constant 24 : index
    %75 = vector.load %arg4[%c0_46, %c0_47, %c24_48] : memref<1x8x32xbf16, #tpu.memory_space<vmem>>, vector<1x8x8xbf16>
    %76 = vector.shape_cast %75 : vector<1x8x8xbf16> to vector<8x8xbf16>
    %cst_49 = arith.constant dense<0.000000e+00> : vector<8x8xf32>
    %77 = tpu.matmul %72, %74, %cst_49 {dimension_numbers = #tpu.dot_dimension_numbers<[1], [1], [0], [0], [0, 0, 1, 0], [], []>} : vector<8x8xbf16>, vector<8x8xbf16>, vector<8x8xf32> -> vector<8x8xf32>
    %cst_50 = arith.constant 0.353553385 : f32
    %78 = vector.broadcast %cst_50 : f32 to vector<8x8xf32>
    %79 = arith.mulf %77, %78 : vector<8x8xf32>
    %80 = vector.broadcast %1 : vector<1x8xf32> to vector<8x8xf32>
    %81 = arith.addf %79, %80 : vector<8x8xf32>
    %cst_51 = arith.constant dense<0xFF800000> : vector<8xf32>
    %82 = vector.multi_reduction <maximumf>, %81, %cst_51 [1] : vector<8x8xf32> to vector<8xf32>
    %83 = vector.shape_cast %82 : vector<8xf32> to vector<8x1xf32>
    %84 = vector.broadcast %83 : vector<8x1xf32> to vector<8x8xf32>
    %85 = arith.subf %81, %84 : vector<8x8xf32>
    %86 = math.exp %85 : vector<8x8xf32>
    %cst_52 = arith.constant dense<0.000000e+00> : vector<8xf32>
    %87 = vector.multi_reduction <add>, %86, %cst_52 [1] : vector<8x8xf32> to vector<8xf32>
    %88 = vector.shape_cast %87 : vector<8xf32> to vector<8x1xf32>
    %89 = tpu.reciprocal %88 {approx = true} : vector<8x1xf32> -> vector<8x1xf32>
    %90 = vector.broadcast %89 : vector<8x1xf32> to vector<8x8xf32>
    %91 = arith.mulf %86, %90 : vector<8x8xf32>
    %92 = arith.truncf %91 : vector<8x8xf32> to vector<8x8xbf16>
    %cst_53 = arith.constant dense<0.000000e+00> : vector<8x8xf32>
    %93 = tpu.matmul %92, %76, %cst_53 {dimension_numbers = #tpu.dot_dimension_numbers<[1], [0], [0], [1], [0, 0, 1, 1], [], []>} : vector<8x8xbf16>, vector<8x8xbf16>, vector<8x8xf32> -> vector<8x8xf32>
    %94 = tpu.concatenate %24, %47, %70, %93 in 1 : vector<8x8xf32>, vector<8x8xf32>, vector<8x8xf32>, vector<8x8xf32> -> vector<8x32xf32>
    %95 = arith.truncf %94 : vector<8x32xf32> to vector<8x32xbf16>
    %c0_54 = arith.constant 0 : index
    %c0_55 = arith.constant 0 : index
    %c0_56 = arith.constant 0 : index
    %96 = vector.load %arg6[%c0_54, %c0_55, %c0_56] : memref<1x8x32xbf16, #tpu.memory_space<vmem>>, vector<1x8x32xbf16>
    %97 = vector.shape_cast %96 : vector<1x8x32xbf16> to vector<8x32xbf16>
    %98 = vector.shape_cast %95 : vector<8x32xbf16> to vector<1x8x32xbf16>
    tpu.vector_store %arg6[%c0_54, %c0_55, %c0_56], %98 {strides = array<i32>} : memref<1x8x32xbf16, #tpu.memory_space<vmem>>, vector<1x8x32xbf16>,
    return
  }
  func.func @transform_0(%arg0: i32, %arg1: i32) -> (i32, i32, i32) {
    %c0_i32 = arith.constant 0 : i32
    %c0_i32_0 = arith.constant 0 : i32
    return %arg0, %c0_i32, %arg1 : i32, i32, i32
  }
  func.func @transform_1(%arg0: i32, %arg1: i32) -> (i32, i32, i32) {
    %c0_i32 = arith.constant 0 : i32
    %c0_i32_0 = arith.constant 0 : i32
    return %arg0, %c0_i32, %arg1 : i32, i32, i32
  }
  func.func @transform_2(%arg0: i32, %arg1: i32) -> (i32, i32, i32) {
    %c0_i32 = arith.constant 0 : i32
    %c0_i32_0 = arith.constant 0 : i32
    return %arg0, %c0_i32, %arg1 : i32, i32, i32
  }
  func.func @transform_3(%arg0: i32, %arg1: i32) -> (i32, i32, i32) {
    %c0_i32 = arith.constant 0 : i32
    %c0_i32_0 = arith.constant 0 : i32
    %c0_i32_1 = arith.constant 0 : i32
    return %arg0, %c0_i32, %c0_i32_0 : i32, i32, i32
  }
  func.func @transform_4(%arg0: i32, %arg1: i32) -> (i32, i32, i32) {
    %c0_i32 = arith.constant 0 : i32
    %c0_i32_0 = arith.constant 0 : i32
    return %arg0, %c0_i32, %arg1 : i32, i32, i32
  }
}

module attributes {stable_mosaic.version = 11 : i64} {
  func.func @_dense_add_ln_kernel(%arg0: i32, %arg1: memref<16x32xbf16, #tpu.memory_space<vmem>>, %arg2: memref<32x32xbf16, #tpu.memory_space<vmem>>, %arg3: memref<1x32xf32, #tpu.memory_space<vmem>>, %arg4: memref<16x32xbf16, #tpu.memory_space<vmem>>, %arg5: memref<1x32xf32, #tpu.memory_space<vmem>>, %arg6: memref<1x32xf32, #tpu.memory_space<vmem>>, %arg7: memref<16x32xbf16, #tpu.memory_space<vmem>>) attributes {dimension_semantics = [#tpu.dimension_semantics<parallel>], iteration_bounds = array<i64: 1>, scalar_prefetch = 0 : i64, scratch_operands = 0 : i64, tpu.core_type = #tpu.core_type<tc>, window_params = [{transform_indices = @transform_0, window_bounds = array<i64: 16, 32>}, {pipeline_mode = #tpu.pipeline_mode<synchronous>, transform_indices = @transform_1, window_bounds = array<i64: 32, 32>}, {pipeline_mode = #tpu.pipeline_mode<synchronous>, transform_indices = @transform_2, window_bounds = array<i64: 1, 32>}, {transform_indices = @transform_3, window_bounds = array<i64: 16, 32>}, {pipeline_mode = #tpu.pipeline_mode<synchronous>, transform_indices = @transform_4, window_bounds = array<i64: 1, 32>}, {pipeline_mode = #tpu.pipeline_mode<synchronous>, transform_indices = @transform_5, window_bounds = array<i64: 1, 32>}, {transform_indices = @transform_6, window_bounds = array<i64: 16, 32>}]} {
    %c0 = arith.constant 0 : index
    %c0_0 = arith.constant 0 : index
    %0 = vector.load %arg1[%c0, %c0_0] : memref<16x32xbf16, #tpu.memory_space<vmem>>, vector<16x32xbf16>
    %c0_1 = arith.constant 0 : index
    %c0_2 = arith.constant 0 : index
    %1 = vector.load %arg2[%c0_1, %c0_2] : memref<32x32xbf16, #tpu.memory_space<vmem>>, vector<32x32xbf16>
    %cst = arith.constant dense<0.000000e+00> : vector<16x32xf32>
    %2 = tpu.matmul %0, %1, %cst {dimension_numbers = #tpu.dot_dimension_numbers<[1], [0], [0], [1], [0, 0, 1, 1], [], []>} : vector<16x32xbf16>, vector<32x32xbf16>, vector<16x32xf32> -> vector<16x32xf32>
    %c0_3 = arith.constant 0 : index
    %c0_4 = arith.constant 0 : index
    %3 = vector.load %arg3[%c0_3, %c0_4] : memref<1x32xf32, #tpu.memory_space<vmem>>, vector<1x32xf32>
    %4 = vector.broadcast %3 : vector<1x32xf32> to vector<16x32xf32>
    %5 = arith.addf %2, %4 : vector<16x32xf32>
    %c0_5 = arith.constant 0 : index
    %c0_6 = arith.constant 0 : index
    %6 = vector.load %arg4[%c0_5, %c0_6] : memref<16x32xbf16, #tpu.memory_space<vmem>>, vector<16x32xbf16>
    %7 = arith.extf %6 : vector<16x32xbf16> to vector<16x32xf32>
    %8 = arith.addf %5, %7 : vector<16x32xf32>
    %cst_7 = arith.constant dense<0.000000e+00> : vector<16xf32>
    %9 = vector.multi_reduction <add>, %8, %cst_7 [1] : vector<16x32xf32> to vector<16xf32>
    %10 = vector.shape_cast %9 : vector<16xf32> to vector<16x1xf32>
    %cst_8 = arith.constant 3.200000e+01 : f32
    %11 = vector.broadcast %cst_8 : f32 to vector<16x1xf32>
    %12 = arith.divf %10, %11 : vector<16x1xf32>
    %13 = vector.broadcast %12 : vector<16x1xf32> to vector<16x32xf32>
    %14 = arith.subf %8, %13 : vector<16x32xf32>
    %15 = arith.mulf %14, %14 : vector<16x32xf32>
    %cst_9 = arith.constant dense<0.000000e+00> : vector<16xf32>
    %16 = vector.multi_reduction <add>, %15, %cst_9 [1] : vector<16x32xf32> to vector<16xf32>
    %17 = vector.shape_cast %16 : vector<16xf32> to vector<16x1xf32>
    %cst_10 = arith.constant 3.200000e+01 : f32
    %18 = vector.broadcast %cst_10 : f32 to vector<16x1xf32>
    %19 = arith.divf %17, %18 : vector<16x1xf32>
    %20 = vector.broadcast %12 : vector<16x1xf32> to vector<16x32xf32>
    %21 = arith.subf %8, %20 : vector<16x32xf32>
    %cst_11 = arith.constant 9.99999996E-13 : f32
    %22 = vector.broadcast %cst_11 : f32 to vector<16x1xf32>
    %23 = arith.addf %19, %22 : vector<16x1xf32>
    %24 = math.rsqrt %23 : vector<16x1xf32>
    %25 = vector.broadcast %24 : vector<16x1xf32> to vector<16x32xf32>
    %26 = arith.mulf %21, %25 : vector<16x32xf32>
    %c0_12 = arith.constant 0 : index
    %c0_13 = arith.constant 0 : index
    %27 = vector.load %arg5[%c0_12, %c0_13] : memref<1x32xf32, #tpu.memory_space<vmem>>, vector<1x32xf32>
    %28 = vector.broadcast %27 : vector<1x32xf32> to vector<16x32xf32>
    %29 = arith.mulf %26, %28 : vector<16x32xf32>
    %c0_14 = arith.constant 0 : index
    %c0_15 = arith.constant 0 : index
    %30 = vector.load %arg6[%c0_14, %c0_15] : memref<1x32xf32, #tpu.memory_space<vmem>>, vector<1x32xf32>
    %31 = vector.broadcast %30 : vector<1x32xf32> to vector<16x32xf32>
    %32 = arith.addf %29, %31 : vector<16x32xf32>
    %33 = arith.truncf %32 : vector<16x32xf32> to vector<16x32xbf16>
    %c0_16 = arith.constant 0 : index
    %c0_17 = arith.constant 0 : index
    %34 = vector.load %arg7[%c0_16, %c0_17] : memref<16x32xbf16, #tpu.memory_space<vmem>>, vector<16x32xbf16>
    tpu.vector_store %arg7[%c0_16, %c0_17], %33 {strides = array<i32>} : memref<16x32xbf16, #tpu.memory_space<vmem>>, vector<16x32xbf16>,
    return
  }
  func.func @transform_0(%arg0: i32) -> (i32, i32) {
    %c0_i32 = arith.constant 0 : i32
    %c0_i32_0 = arith.constant 0 : i32
    return %arg0, %c0_i32 : i32, i32
  }
  func.func @transform_1(%arg0: i32) -> (i32, i32) {
    %c0_i32 = arith.constant 0 : i32
    %c0_i32_0 = arith.constant 0 : i32
    %c0_i32_1 = arith.constant 0 : i32
    return %c0_i32, %c0_i32_0 : i32, i32
  }
  func.func @transform_2(%arg0: i32) -> (i32, i32) {
    %c0_i32 = arith.constant 0 : i32
    %c0_i32_0 = arith.constant 0 : i32
    %c0_i32_1 = arith.constant 0 : i32
    return %c0_i32, %c0_i32_0 : i32, i32
  }
  func.func @transform_3(%arg0: i32) -> (i32, i32) {
    %c0_i32 = arith.constant 0 : i32
    %c0_i32_0 = arith.constant 0 : i32
    return %arg0, %c0_i32 : i32, i32
  }
  func.func @transform_4(%arg0: i32) -> (i32, i32) {
    %c0_i32 = arith.constant 0 : i32
    %c0_i32_0 = arith.constant 0 : i32
    %c0_i32_1 = arith.constant 0 : i32
    return %c0_i32, %c0_i32_0 : i32, i32
  }
  func.func @transform_5(%arg0: i32) -> (i32, i32) {
    %c0_i32 = arith.constant 0 : i32
    %c0_i32_0 = arith.constant 0 : i32
    %c0_i32_1 = arith.constant 0 : i32
    return %c0_i32, %c0_i32_0 : i32, i32
  }
  func.func @transform_6(%arg0: i32) -> (i32, i32) {
    %c0_i32 = arith.constant 0 : i32
    %c0_i32_0 = arith.constant 0 : i32
    return %arg0, %c0_i32 : i32, i32
  }
}

module attributes {stable_mosaic.version = 11 : i64} {
  func.func @_dense_add_ln_kernel(%arg0: i32, %arg1: memref<16x64xbf16, #tpu.memory_space<vmem>>, %arg2: memref<64x32xbf16, #tpu.memory_space<vmem>>, %arg3: memref<1x32xf32, #tpu.memory_space<vmem>>, %arg4: memref<16x32xbf16, #tpu.memory_space<vmem>>, %arg5: memref<1x32xf32, #tpu.memory_space<vmem>>, %arg6: memref<1x32xf32, #tpu.memory_space<vmem>>, %arg7: memref<16x32xbf16, #tpu.memory_space<vmem>>) attributes {dimension_semantics = [#tpu.dimension_semantics<parallel>], iteration_bounds = array<i64: 1>, scalar_prefetch = 0 : i64, scratch_operands = 0 : i64, tpu.core_type = #tpu.core_type<tc>, window_params = [{transform_indices = @transform_0, window_bounds = array<i64: 16, 64>}, {pipeline_mode = #tpu.pipeline_mode<synchronous>, transform_indices = @transform_1, window_bounds = array<i64: 64, 32>}, {pipeline_mode = #tpu.pipeline_mode<synchronous>, transform_indices = @transform_2, window_bounds = array<i64: 1, 32>}, {transform_indices = @transform_3, window_bounds = array<i64: 16, 32>}, {pipeline_mode = #tpu.pipeline_mode<synchronous>, transform_indices = @transform_4, window_bounds = array<i64: 1, 32>}, {pipeline_mode = #tpu.pipeline_mode<synchronous>, transform_indices = @transform_5, window_bounds = array<i64: 1, 32>}, {transform_indices = @transform_6, window_bounds = array<i64: 16, 32>}]} {
    %c0 = arith.constant 0 : index
    %c0_0 = arith.constant 0 : index
    %0 = vector.load %arg1[%c0, %c0_0] : memref<16x64xbf16, #tpu.memory_space<vmem>>, vector<16x64xbf16>
    %c0_1 = arith.constant 0 : index
    %c0_2 = arith.constant 0 : index
    %1 = vector.load %arg2[%c0_1, %c0_2] : memref<64x32xbf16, #tpu.memory_space<vmem>>, vector<64x32xbf16>
    %cst = arith.constant dense<0.000000e+00> : vector<16x32xf32>
    %2 = tpu.matmul %0, %1, %cst {dimension_numbers = #tpu.dot_dimension_numbers<[1], [0], [0], [1], [0, 0, 1, 1], [], []>} : vector<16x64xbf16>, vector<64x32xbf16>, vector<16x32xf32> -> vector<16x32xf32>
    %c0_3 = arith.constant 0 : index
    %c0_4 = arith.constant 0 : index
    %3 = vector.load %arg3[%c0_3, %c0_4] : memref<1x32xf32, #tpu.memory_space<vmem>>, vector<1x32xf32>
    %4 = vector.broadcast %3 : vector<1x32xf32> to vector<16x32xf32>
    %5 = arith.addf %2, %4 : vector<16x32xf32>
    %c0_5 = arith.constant 0 : index
    %c0_6 = arith.constant 0 : index
    %6 = vector.load %arg4[%c0_5, %c0_6] : memref<16x32xbf16, #tpu.memory_space<vmem>>, vector<16x32xbf16>
    %7 = arith.extf %6 : vector<16x32xbf16> to vector<16x32xf32>
    %8 = arith.addf %5, %7 : vector<16x32xf32>
    %cst_7 = arith.constant dense<0.000000e+00> : vector<16xf32>
    %9 = vector.multi_reduction <add>, %8, %cst_7 [1] : vector<16x32xf32> to vector<16xf32>
    %10 = vector.shape_cast %9 : vector<16xf32> to vector<16x1xf32>
    %cst_8 = arith.constant 3.200000e+01 : f32
    %11 = vector.broadcast %cst_8 : f32 to vector<16x1xf32>
    %12 = arith.divf %10, %11 : vector<16x1xf32>
    %13 = vector.broadcast %12 : vector<16x1xf32> to vector<16x32xf32>
    %14 = arith.subf %8, %13 : vector<16x32xf32>
    %15 = arith.mulf %14, %14 : vector<16x32xf32>
    %cst_9 = arith.constant dense<0.000000e+00> : vector<16xf32>
    %16 = vector.multi_reduction <add>, %15, %cst_9 [1] : vector<16x32xf32> to vector<16xf32>
    %17 = vector.shape_cast %16 : vector<16xf32> to vector<16x1xf32>
    %cst_10 = arith.constant 3.200000e+01 : f32
    %18 = vector.broadcast %cst_10 : f32 to vector<16x1xf32>
    %19 = arith.divf %17, %18 : vector<16x1xf32>
    %20 = vector.broadcast %12 : vector<16x1xf32> to vector<16x32xf32>
    %21 = arith.subf %8, %20 : vector<16x32xf32>
    %cst_11 = arith.constant 9.99999996E-13 : f32
    %22 = vector.broadcast %cst_11 : f32 to vector<16x1xf32>
    %23 = arith.addf %19, %22 : vector<16x1xf32>
    %24 = math.rsqrt %23 : vector<16x1xf32>
    %25 = vector.broadcast %24 : vector<16x1xf32> to vector<16x32xf32>
    %26 = arith.mulf %21, %25 : vector<16x32xf32>
    %c0_12 = arith.constant 0 : index
    %c0_13 = arith.constant 0 : index
    %27 = vector.load %arg5[%c0_12, %c0_13] : memref<1x32xf32, #tpu.memory_space<vmem>>, vector<1x32xf32>
    %28 = vector.broadcast %27 : vector<1x32xf32> to vector<16x32xf32>
    %29 = arith.mulf %26, %28 : vector<16x32xf32>
    %c0_14 = arith.constant 0 : index
    %c0_15 = arith.constant 0 : index
    %30 = vector.load %arg6[%c0_14, %c0_15] : memref<1x32xf32, #tpu.memory_space<vmem>>, vector<1x32xf32>
    %31 = vector.broadcast %30 : vector<1x32xf32> to vector<16x32xf32>
    %32 = arith.addf %29, %31 : vector<16x32xf32>
    %33 = arith.truncf %32 : vector<16x32xf32> to vector<16x32xbf16>
    %c0_16 = arith.constant 0 : index
    %c0_17 = arith.constant 0 : index
    %34 = vector.load %arg7[%c0_16, %c0_17] : memref<16x32xbf16, #tpu.memory_space<vmem>>, vector<16x32xbf16>
    tpu.vector_store %arg7[%c0_16, %c0_17], %33 {strides = array<i32>} : memref<16x32xbf16, #tpu.memory_space<vmem>>, vector<16x32xbf16>,
    return
  }
  func.func @transform_0(%arg0: i32) -> (i32, i32) {
    %c0_i32 = arith.constant 0 : i32
    %c0_i32_0 = arith.constant 0 : i32
    return %arg0, %c0_i32 : i32, i32
  }
  func.func @transform_1(%arg0: i32) -> (i32, i32) {
    %c0_i32 = arith.constant 0 : i32
    %c0_i32_0 = arith.constant 0 : i32
    %c0_i32_1 = arith.constant 0 : i32
    return %c0_i32, %c0_i32_0 : i32, i32
  }
  func.func @transform_2(%arg0: i32) -> (i32, i32) {
    %c0_i32 = arith.constant 0 : i32
    %c0_i32_0 = arith.constant 0 : i32
    %c0_i32_1 = arith.constant 0 : i32
    return %c0_i32, %c0_i32_0 : i32, i32
  }
  func.func @transform_3(%arg0: i32) -> (i32, i32) {
    %c0_i32 = arith.constant 0 : i32
    %c0_i32_0 = arith.constant 0 : i32
    return %arg0, %c0_i32 : i32, i32
  }
  func.func @transform_4(%arg0: i32) -> (i32, i32) {
    %c0_i32 = arith.constant 0 : i32
    %c0_i32_0 = arith.constant 0 : i32
    %c0_i32_1 = arith.constant 0 : i32
    return %c0_i32, %c0_i32_0 : i32, i32
  }
  func.func @transform_5(%arg0: i32) -> (i32, i32) {
    %c0_i32 = arith.constant 0 : i32
    %c0_i32_0 = arith.constant 0 : i32
    %c0_i32_1 = arith.constant 0 : i32
    return %c0_i32, %c0_i32_0 : i32, i32
  }
  func.func @transform_6(%arg0: i32) -> (i32, i32) {
    %c0_i32 = arith.constant 0 : i32
    %c0_i32_0 = arith.constant 0 : i32
    return %arg0, %c0_i32 : i32, i32
  }
}

</mosaic_0001>

<bundles_post_ra>
// kernel: encoder_forward.10
= control target key start
LH: loop header
LB: loop body
LE: loop exit
PB: predicated region body
PF: predicated region fallthrough
CT: control target
= control target key end

     0   :  { %v130_v0 = vmov 0.0   ;;  %vm131_vm0 = vmmov 0   ;;  %vm45_vm1 = vcmask 261120   ;;  %vm98_vm2 = vcmask 781312   ;;  %s170_s1 = inlined_call_operand.vmem [shape: bf16[32,96], index: 1, kind: input, shape index: {}]   ;;  %s171_s0 = inlined_call_operand.vmem [shape: bf16[16,32], index: 0, kind: input, shape index: {}]   ;;  %s172_s2 = inlined_call_operand.vmem [shape: f32[1,96], index: 2, kind: input, shape index: {}]   ;;  %s173_s3 = inlined_call_operand.vmem [shape: bf16[16,96], index: 3, kind: output, shape index: {}]  }
   0x1   :  { %117 = vmatprep.subr.bf16.mxu0 %v130_v0  ;;  %v127_v1 = vld [vmem:[%s170_s1] sm:$0xff]   ;;  %121 = vmatprep.mubr.msk.bf16.mxu0 %vm131_vm0, %v130_v0  ;;  %v128_v2 = vld [vmem:[%s170_s1 + $0x8] sm:$0xff]  }
   0x2   :  { %118 = vmatpush3.bf16.msra.mxu0 %v127_v1  ;;  %v129_v3 = vld [vmem:[%s171_s0] sm:$0xff]  }
   0x3   :  { %119 = vmatprep.subr.bf16.mxu0 %v130_v0  ;;  %v105_v4 = vld [vmem:[%s172_s2] ss:$0 sm:$0xff] }
   0x6   :  { %120 = vmatpush3.bf16.msra.mxu0 %v128_v2 }
   0x9   :  { %122 = vmatmul.mubr.msk.bf16.vlgmr.msra.gmra.mrb[0].mxu0 %vm45_vm1, %v129_v3 }
  0xdc   :  { %v83_v5 = vpop.f32.mrb[0].mxu0 }
  0xdd   :  { %v84_v6 = vadd.f32 %v105_v4, %v83_v5  ;;  %v123_v7 = vpop.f32.mrb[1].mxu0 }
  0xde   :  { %v86_v8 = vpop.f32.mrb[2].mxu0 }
  0xdf   :  { %v112_v9 = vpack.c.bf16 %v84_v6, %v84_v6  ;;  %v87_v10 = vadd.f32 %v105_v4, %v86_v8  ;;  %v124_v11 = vpop.f32.mrb[3].mxu0 }
  0xe1   :  { %99 = vst.msk [vmem:[%s173_s3] sm:$0xf] %vm98_vm2, %v112_v9  ;;  %v113_v12 = vpack.c.bf16 %v87_v10, %v87_v10 }
  0xe3   :  { %100 = vst.msk [vmem:[%s173_s3 + $0x4] sm:$0xf] %vm98_vm2, %v113_v12 }

// kernel: encoder_forward.13
= control target key start
LH: loop header
LB: loop body
LE: loop exit
PB: predicated region body
PF: predicated region fallthrough
CT: control target
= control target key end

     0   :  { %v152_v0 = vmov 0.0   ;;  %vm153_vm0 = vmmov 0   ;;  %vm45_vm1 = vcmask 261120   ;;  %vm116_vm2 = vcmask 519168   ;;  %s192_s1 = inlined_call_operand.vmem [shape: bf16[32,64], index: 1, kind: input, shape index: {}]   ;;  %s193_s0 = inlined_call_operand.vmem [shape: bf16[16,32], index: 0, kind: input, shape index: {}]   ;;  %s194_s2 = inlined_call_operand.vmem [shape: f32[1,64], index: 2, kind: input, shape index: {}]   ;;  %s195_s3 = inlined_call_operand.vmem [shape: bf16[16,64], index: 3, kind: output, shape index: {}]  }
   0x1   :  { %135 = vmatprep.subr.bf16.mxu0 %v152_v0  ;;  %v145_v1 = vld [vmem:[%s192_s1] sm:$0xff]   ;;  %139 = vmatprep.mubr.msk.bf16.mxu0 %vm153_vm0, %v152_v0  ;;  %v146_v2 = vld [vmem:[%s192_s1 + $0x8] sm:$0xff]  }
   0x2   :  { %136 = vmatpush3.bf16.msra.mxu0 %v145_v1  ;;  %v147_v3 = vld [vmem:[%s193_s0] sm:$0xff]  }
   0x3   :  { %137 = vmatprep.subr.bf16.mxu0 %v152_v0  ;;  %v123_v4 = vld [vmem:[%s194_s2] ss:$0 sm:$0xff] }
   0x6   :  { %138 = vmatpush3.bf16.msra.mxu0 %v146_v2 }
   0x9   :  { %140 = vmatmul.mubr.msk.bf16.vlgmr.msra.gmra.mrb[0].mxu0 %vm45_vm1, %v147_v3 }
  0xdc   :  { %v83_v5 = vpop.f32.mrb[0].mxu0 }
  0xdd   :  { %v84_v6 = vadd.f32 %v123_v4, %v83_v5  ;;  %v141_v7 = vpop.f32.mrb[1].mxu0 }
  0xde   :  { %v86_v8 = vpop.f32.mrb[2].mxu0 }
  0xdf   :  { %v92_v9 = vmul.f32 0.044715, %v84_v6  ;;  %v87_v10 = vadd.f32 %v123_v4, %v86_v8  ;;  %v142_v11 = vpop.f32.mrb[3].mxu0  ;;  %v90_v22 = vmul.f32 0.5, %v84_v6 }
  0xe1   :  { %v94_v12 = vmul.f32 %v92_v9, %v84_v6  ;;  %v93_v13 = vmul.f32 0.044715, %v87_v10  ;;  %v91_v26 = vmul.f32 0.5, %v87_v10 }
  0xe3   :  { %v96_v14 = vmul.f32 %v94_v12, %v84_v6  ;;  %v95_v15 = vmul.f32 %v93_v13, %v87_v10 }
  0xe5   :  { %v98_v16 = vadd.f32 %v96_v14, %v84_v6  ;;  %v97_v17 = vmul.f32 %v95_v15, %v87_v10 }
  0xe7   :  { %v100_v18 = vmul.f32 0.7978846, %v98_v16  ;;  %v99_v19 = vadd.f32 %v97_v17, %v87_v10 }
  0xe9   :  { %148 = vtanh.f32 %v100_v18  ;;  %v101_v20 = vmul.f32 0.7978846, %v99_v19 }
  0xeb   :  { %150 = vtanh.f32 %v101_v20 }
  0xf3   :  { %v149_v21 = vpop.eup %148 }
  0xf4   :  { %v104_v23 = vadd.f32 1.0, %v149_v21 }
  0xf5   :  { %v151_v24 = vpop.eup %150 }
  0xf6   :  { %v106_v25 = vmul.f32 %v104_v23, %v90_v22  ;;  %v105_v27 = vadd.f32 1.0, %v151_v24 }
  0xf8   :  { %v130_v28 = vpack.c.bf16 %v106_v25, %v106_v25  ;;  %v107_v29 = vmul.f32 %v105_v27, %v91_v26 }
  0xfa   :  { %117 = vst.msk [vmem:[%s195_s3] sm:$0xf] %vm116_vm2, %v130_v28  ;;  %v131_v30 = vpack.c.bf16 %v107_v29, %v107_v29 }
  0xfc   :  { %118 = vst.msk [vmem:[%s195_s3 + $0x4] sm:$0xf] %vm116_vm2, %v131_v30 }

// kernel: encoder_forward.12
= control target key start
LH: loop header
LB: loop body
LE: loop exit
PB: predicated region body
PF: predicated region fallthrough
CT: control target
= control target key end

     0   :  { %v200_v0 = vmov 0.0   ;;  %vm201_vm0 = vmmov 0   ;;  %vm54_vm1 = vcmask 261120   ;;  %vm158_vm2 = vcmask 257024   ;;  %s269_s1 = inlined_call_operand.vmem [shape: bf16[32,32], index: 1, kind: input, shape index: {}]   ;;  %s270_s0 = inlined_call_operand.vmem [shape: bf16[16,32], index: 0, kind: input, shape index: {}]   ;;  %s271_s3 = inlined_call_operand.vmem [shape: bf16[16,32], index: 3, kind: input, shape index: {}]   ;;  %s272_s2 = inlined_call_operand.vmem [shape: f32[1,32], index: 2, kind: input, shape index: {}]   ;;  %s273_s4 = inlined_call_operand.vmem [shape: f32[1,32], index: 4, kind: input, shape index: {}]   ;;  %s274_s5 = inlined_call_operand.vmem [shape: f32[1,32], index: 5, kind: input, shape index: {}]   ;;  %s275_s6 = inlined_call_operand.vmem [shape: bf16[16,32], index: 6, kind: output, shape index: {}]  }
   0x1   :  { %183 = vmatprep.subr.bf16.mxu0 %v200_v0  ;;  %v193_v1 = vld [vmem:[%s269_s1] sm:$0xff]   ;;  %187 = vmatprep.mubr.msk.bf16.mxu0 %vm201_vm0, %v200_v0  ;;  %v194_v2 = vld [vmem:[%s269_s1 + $0x8] sm:$0xff]  }
   0x2   :  { %184 = vmatpush3.bf16.msra.mxu0 %v193_v1  ;;  %v195_v3 = vld [vmem:[%s270_s0] sm:$0xff]  }
   0x3   :  { %185 = vmatprep.subr.bf16.mxu0 %v200_v0  ;;  %v177_v4 = vld [vmem:[%s271_s3] sm:$0xff]  }
   0x4   :  { %v165_v5 = vld [vmem:[%s272_s2] ss:$0 sm:$0xff]  ;;  %v178_v6 = vunpack.c.l.bf16 %v177_v4  ;;  %v179_v10 = vunpack.c.h.bf16 %v177_v4 }
   0x5   :  { %v170_v35 = vld [vmem:[%s273_s4] ss:$0 sm:$0xff] }
   0x6   :  { %186 = vmatpush3.bf16.msra.mxu0 %v194_v2  ;;  %v171_v37 = vld [vmem:[%s274_s5] ss:$0 sm:$0xff] }
   0x9   :  { %188 = vmatmul.mubr.msk.bf16.vlgmr.msra.gmra.mrb[0].mxu0 %vm54_vm1, %v195_v3 }
  0xdc   :  { %v92_v7 = vpop.f32.mrb[0].mxu0 }
  0xdd   :  { %v93_v8 = vadd.f32 %v165_v5, %v92_v7  ;;  %v189_v9 = vpop.f32.mrb[1].mxu0 }
  0xde   :  { %v95_v11 = vpop.f32.mrb[2].mxu0 }
  0xdf   :  { %v96_v12 = vadd.f32 %v165_v5, %v95_v11  ;;  %v190_v13 = vpop.f32.mrb[3].mxu0  ;;  %v103_v14 = vadd.f32 %v178_v6, %v93_v8 }
  0xe1   :  { %v105_v15 = vsel %vm54_vm1, %v103_v14, 0.0  ;;  %v104_v16 = vadd.f32 %v179_v10, %v96_v12 }
  0xe2   :  { %106 = vadd.xlane.f32.xlu0 %v105_v15 }
  0xe3   :  { %v108_v17 = vsel %vm54_vm1, %v104_v16, 0.0 }
  0xe6   :  { %109 = vadd.xlane.f32.xlu0 %v108_v17 }
 0x16f   :  { %v107_v18 = vpop.xlane.xlu0 %106 }
 0x170   :  { %v112_v19 = vmul.f32 0.03125, %v107_v18 }
 0x172   :  { %v114_v20 = vsub.f32 %v103_v14, %v112_v19 }
 0x173   :  { %v110_v21 = vpop.xlane.xlu0 %109 }
 0x174   :  { %v113_v22 = vmul.f32 0.03125, %v110_v21  ;;  %v116_v23 = vmul.f32 %v114_v20, %v114_v20 }
 0x176   :  { %v115_v24 = vsub.f32 %v104_v16, %v113_v22  ;;  %v118_v25 = vsel %vm54_vm1, %v116_v23, 0.0 }
 0x177   :  { %119 = vadd.xlane.f32.xlu1 %v118_v25 }
 0x178   :  { %v117_v26 = vmul.f32 %v115_v24, %v115_v24 }
 0x17a   :  { %v121_v27 = vsel %vm54_vm1, %v117_v26, 0.0 }
 0x17b   :  { %122 = vadd.xlane.f32.xlu1 %v121_v27 }
 0x204   :  { %v120_v28 = vpop.xlane.xlu1 %119 }
 0x205   :  { %v124_v29 = vmul.f32 0.03125, %v120_v28 }
 0x207   :  { %v126_v30 = vadd.f32 1e-12, %v124_v29 }
 0x208   :  { %v123_v31 = vpop.xlane.xlu1 %122 }
 0x209   :  { %196 = vrsqrt.f32 %v126_v30  ;;  %v125_v32 = vmul.f32 0.03125, %v123_v31 }
 0x20b   :  { %v127_v33 = vadd.f32 1e-12, %v125_v32 }
 0x20d   :  { %198 = vrsqrt.f32 %v127_v33 }
 0x213   :  { %v197_v34 = vpop.eup %196 }
 0x214   :  { %v130_v36 = vmul.f32 %v197_v34, %v114_v20 }
 0x216   :  { %v139_v38 = vmul.f32 %v170_v35, %v130_v36 }
 0x217   :  { %v199_v39 = vpop.eup %198 }
 0x218   :  { %v148_v40 = vadd.f32 %v171_v37, %v139_v38  ;;  %v131_v41 = vmul.f32 %v199_v39, %v115_v24 }
 0x21a   :  { %v174_v42 = vpack.c.bf16 %v148_v40, %v148_v40  ;;  %v140_v43 = vmul.f32 %v170_v35, %v131_v41 }
 0x21c   :  { %159 = vst.msk [vmem:[%s275_s6] sm:$0xf] %vm158_vm2, %v174_v42  ;;  %v149_v44 = vadd.f32 %v171_v37, %v140_v43 }
 0x21e   :  { %v175_v45 = vpack.c.bf16 %v149_v44, %v149_v44 }
 0x220   :  { %160 = vst.msk [vmem:[%s275_s6 + $0x4] sm:$0xf] %vm158_vm2, %v175_v45 }

// kernel: encoder_forward.11
= control target key start
LH: loop header
LB: loop body
LE: loop exit
PB: predicated region body
PF: predicated region fallthrough
CT: control target
= control target key end

     0   :  { %s1086_s15 = smov 0   ;;  %s1088_s16 = smov 0   ;;  %s1206_s0 = inlined_call_operand.vmem [shape: bf16[2,8,32], index: 0, kind: input, shape index: {}]   ;;  %s1207_s1 = inlined_call_operand.vmem [shape: bf16[2,8,32], index: 1, kind: input, shape index: {}]   ;;  %s1208_s2 = inlined_call_operand.vmem [shape: bf16[2,8,32], index: 2, kind: input, shape index: {}]   ;;  %s1209_s3 = inlined_call_operand.vmem [shape: f32[2,1,8], index: 3, kind: input, shape index: {}]   ;;  %s1210_s4 = inlined_call_operand.vmem [shape: bf16[2,8,32], index: 4, kind: output, shape index: {}]  }
   0x1   :  { %s1090_s17 = smov 0  }
   0x2 LB: > { %s26_s18 = sadd.s32 1, %s1047_s16  ;;  %p895_p0 = scmp.ge.s32.totalorder %s1051_s17, 1  ;;  %s1051_s17 = sphi %s1090_s17, %s14_s17   ;;  %s1047_s16 = sphi %s1088_s16, %s1212_s16   ;;  %s1043_s15 = sphi %s1086_s15, %s1211_s15  }
   0x3   : > { %p28_p1 = scmp.ge.s32.totalorder %s26_s18, 2  ;;  %p216_p2 = scmp.lt.s32.totalorder %s1051_s17, 3 }
   0x5   : > { %s1214_s18 = smov (%p28_p1, %s26_s18), 0  ;;  %p217_p3 = pnand %p895_p0, %p216_p2 }
   0x6   : > { %p263_p4 = scmp.lt.s32.totalorder (!%p217_p3), %s1043_s15, 1  ;;  %v1053_v0 = vmov (!%p217_p3), 0.0   ;;  %vm1054_vm0 = vmmov (!%p217_p3), 0   ;;  %vm299_vm1 = vcmask (!%p217_p3), 64512   ;;  %s1055_s29 = smov (!%p217_p3), 120   ;;  %vm369_vm2 = vcmask (!%p217_p3), 1043456  }
   0x7   : > { %220 = sbr.rel (%p217_p3) target bundleno = 1482 (0x5ca), region = 36  ;;  %930 = vmatprep.subr.bf16.mxu0 (!%p217_p3), %v1053_v0  ;;  %932 = vmatprep.mubr.msk.bf16.mxu0 (!%p217_p3), %vm1054_vm0, %v1053_v0  ;;  %s1056_s30 = smov (!%p217_p3), 112   ;;  %vm771_vm3 = vcmask (!%p217_p3), 130048   ;;  %vm773_vm4 = vcmask (!%p217_p3), 195584   ;;  %vm776_vm5 = vcmask (!%p217_p3), 257024  }
   0x8   : > { %936 = vmatprep.subr.bf16.mxu1 (!%p217_p3), %v1053_v0  ;;  %938 = vmatprep.mubr.msk.bf16.mxu1 (!%p217_p3), %vm1054_vm0, %v1053_v0  ;;  %s1057_s5 = smov (!%p217_p3), 104   ;;  %s1058_s9 = smov (!%p217_p3), 8  }
   0x9   : > { %s1059_s10 = smov (!%p217_p3), 16   ;;  %s1060_s11 = smov (!%p217_p3), 24  }
   0xe   : > { %s1216_s15 = smov (!%p263_p4, %s1043_s15), 1 }
   0xf   : > { %s1110_s19 = sshll.u32 %s1216_s15, 2  ;;  %s286_s28 = scalar_lea.vmem %s1209_s3, %s1216_s15 }
  0x10   : > { %s276_s22 = scalar_lea.vmem %s1207_s1, %s1110_s19  ;;  %s269_s25 = scalar_lea.vmem %s1206_s0, %s1110_s19  ;;  %v1128_v5 = vld [vmem:[%s286_s28] ss:$0 sm:$0xff] }
  0x11   : > { %v297_v1 = vld [vmem:[%s276_s22] sm:$0xf]  ;;  %s283_s8 = scalar_lea.vmem %s1208_s2, %s1110_s19  ;;  %s293_s14 = scalar_lea.vmem %s1210_s4, %s1110_s19 }
  0x12   : > { %v304_v2 = vsel %vm299_vm1, %v297_v1, 0  ;;  %v296_v3 = vld [vmem:[%s269_s25] sm:$0xf]  ;;  %v904_v12 = vcombine.low %v297_v1, %v297_v1 }
  0x13   : > { %931 = vmatpush3.bf16.xpose.msra.mxu0 %v304_v2  ;;  %v903_v13 = vcombine.low %v296_v3, %v296_v3  ;;  %v1142_v19 = vld [vmem:[%s283_s8] sm:$0xf] }
  0x14   : > { %948 = vmatprep.subr.bf16.mxu0 %v1053_v0  ;;  %421 = vrot.lane.b32.xlu1 %v904_v12, %s1055_s29  ;;  %v371_v20 = vsel %vm369_vm2, %v1142_v19, 0 }
  0x15   : > { %937 = vmatpush3.bf16.msra.mxu1 %v371_v20 }
  0x16   : > { %942 = vmatprep.subr.bf16.mxu1 %v1053_v0 }
  0x18   : > { %416 = vrot.lane.b32.xlu1 %v903_v13, %s1055_s29 }
  0x1a   : > { %933 = vmatmul.mubr.msk.bf16.vlgmr.msra.gmra.mrb[0].mxu0 %vm299_vm1, %v296_v3 }
  0x1b   : > { %950 = vmatprep.mubr.msk.bf16.mxu0 %vm1054_vm0, %v1053_v0 }
  0x1c   : > { %534 = vrot.lane.b32.xlu1 %v903_v13, %s1056_s30 }
  0x20   : > { %648 = vrot.lane.b32.xlu1 %v904_v12, %s1057_s5 }
  0x24   : > { %646 = vrot.lane.b32.xlu1 %v903_v13, %s1057_s5 }
  0x86   : > { %v422_v23 = vpop.permute.xlu1 %421 }
  0x87   : > { %v427_v25 = vsel %vm299_vm1, %v422_v23, 0 }
  0x8a   : > { %v417_v27 = vpop.permute.xlu1 %416 }
  0x8e   : > { %v535_v29 = vpop.permute.xlu1 %534 }
  0x92   : > { %v649_v31 = vpop.permute.xlu1 %648 }
  0x93   : > { %v654_v32 = vsel %vm299_vm1, %v649_v31, 0 }
  0x96   : > { %v647_v33 = vpop.permute.xlu1 %646 }
  0xed   : > { %v340_v4 = vpop.f32.mrb[0].mxu0 }
  0xee   : > { %v346_v6 = vmul.f32 0.35355338, %v340_v4  ;;  %v934_v7 = vpop.f32.mrb[1].mxu0 }
  0xef   : > { %v343_v8 = vpop.f32.mrb[2].mxu0 }
  0xf0   : > { %v935_v9 = vpop.f32.mrb[3].mxu0  ;;  %v353_v10 = vadd.f32 %v1128_v5, %v346_v6 }
  0xf2   : > { %v354_v11 = vsel %vm299_vm1, %v353_v10, -inf }
  0xf3   : > { %355 = vmax.xlane.f32.xlu0 %v354_v11 }
 0x180   : > { %v356_v14 = vpop.xlane.xlu0 %355 }
 0x181   : > { %v357_v15 = vsub.f32 %v353_v10, %v356_v14 }
 0x183   : > { %v358_v16 = vmul.f32 1.442695, %v357_v15 }
 0x185   : > { %1013 = vpow2.f32 %v358_v16 }
 0x18f   : > { %v1014_v17 = vpop.eup %1013 }
 0x190   : > { %v360_v18 = vsel %vm299_vm1, %v1014_v17, 0.0 }
 0x191   : > { %361 = vadd.xlane.f32.xlu0 %v360_v18 }
 0x1a7   : > { %536 = vrot.lane.b32.xlu0 %v904_v12, %s1056_s30 }
 0x21e   : > { %v362_v21 = vpop.xlane.xlu0 %361 }
 0x21f   : > { %1015 = vrcp.f32 %v362_v21 }
 0x222   : > { %v537_v28 = vpop.permute.xlu0 %536 }
 0x223   : > { %v542_v30 = vsel %vm299_vm1, %v537_v28, 0 }
 0x229   : > { %v1016_v22 = vpop.eup %1015 }
 0x22a   : > { %v364_v24 = vmul.f32 %v1016_v22, %v1014_v17 }
 0x22c   : > { %v365_v26 = vpack.c.bf16 %v364_v24, %v364_v24 }
 0x22e   : > { %939 = vmatmul.mubr.msk.bf16.vlgmr.msra.gmra.mrb[0].mxu1 %vm299_vm1, %v365_v26 }
 0x22f   : > { %943 = vmatpush3.bf16.xpose.msra.mxu1 %v427_v25  ;;  %944 = vmatprep.mubr.msk.bf16.mxu1 %vm1054_vm0, %v1053_v0 }
 0x230   : > { %954 = vmatprep.subr.bf16.mxu1 %v1053_v0 }
 0x236   : > { %945 = vmatmul.mubr.msk.bf16.vlgmr.msra.gmra.mrb[4].mxu1 %vm299_vm1, %v417_v27 }
 0x237   : > { %955 = vmatpush3.bf16.xpose.msra.mxu1 %v542_v30  ;;  %956 = vmatprep.mubr.msk.bf16.mxu1 %vm1054_vm0, %v1053_v0 }
 0x238   : > { %966 = vmatprep.subr.bf16.mxu1 %v1053_v0 }
 0x23e   : > { %957 = vmatmul.mubr.msk.bf16.vlgmr.msra.gmra.mrb[8].mxu1 %vm299_vm1, %v535_v29 }
 0x23f   : > { %967 = vmatpush3.bf16.xpose.msra.mxu1 %v654_v32  ;;  %968 = vmatprep.mubr.msk.bf16.mxu1 %vm1054_vm0, %v1053_v0 }
 0x246   : > { %969 = vmatmul.mubr.msk.bf16.vlgmr.msra.gmra.mrb[12].mxu1 %vm299_vm1, %v647_v33 }
 0x301   : > { %v1163_v34 = vpop.f32.mrb[0].mxu1 }
 0x302   : > { %v940_v35 = vpop.f32.mrb[1].mxu1 }
 0x303   : > { %v410_v36 = vpop.f32.mrb[2].mxu1 }
 0x304   : > { %v941_v37 = vpop.f32.mrb[3].mxu1 }
 0x309   : > { %v463_v38 = vpop.f32.mrb[4].mxu1 }
 0x30a   : > { %v469_v39 = vmul.f32 0.35355338, %v463_v38  ;;  %v946_v40 = vpop.f32.mrb[5].mxu1 }
 0x30b   : > { %v466_v41 = vpop.f32.mrb[6].mxu1 }
 0x30c   : > { %v947_v42 = vpop.f32.mrb[7].mxu1  ;;  %v470_v43 = vadd.f32 %v1128_v5, %v469_v39 }
 0x30e   : > { %v471_v44 = vsel %vm299_vm1, %v470_v43, -inf }
 0x30f   : > { %472 = vmax.xlane.f32.xlu1 %v471_v44 }
 0x311   : > { %v578_v45 = vpop.f32.mrb[8].mxu1 }
 0x312   : > { %v584_v46 = vmul.f32 0.35355338, %v578_v45  ;;  %v958_v47 = vpop.f32.mrb[9].mxu1 }
 0x313   : > { %v581_v48 = vpop.f32.mrb[10].mxu1 }
 0x314   : > { %v585_v49 = vadd.f32 %v1128_v5, %v584_v46  ;;  %v959_v50 = vpop.f32.mrb[11].mxu1 }
 0x316   : > { %v586_v51 = vsel %vm299_vm1, %v585_v49, -inf }
 0x317   : > { %587 = vmax.xlane.f32.xlu0 %v586_v51 }
 0x319   : > { %v690_v52 = vpop.f32.mrb[12].mxu1 }
 0x31a   : > { %v696_v53 = vmul.f32 0.35355338, %v690_v52  ;;  %v970_v54 = vpop.f32.mrb[13].mxu1 }
 0x31b   : > { %v693_v55 = vpop.f32.mrb[14].mxu1 }
 0x31c   : > { %v697_v56 = vadd.f32 %v1128_v5, %v696_v53  ;;  %v971_v57 = vpop.f32.mrb[15].mxu1  ;;  %v906_v5 = vcombine.low %v1142_v19, %v1142_v19 }
 0x31e   : > { %v698_v58 = vsel %vm299_vm1, %v697_v56, -inf }
 0x31f   : > { %699 = vmax.xlane.f32.xlu1 %v698_v58 }
 0x39c   : > { %v473_v59 = vpop.xlane.xlu1 %472 }
 0x39d   : > { %v474_v60 = vsub.f32 %v470_v43, %v473_v59 }
 0x39f   : > { %v475_v61 = vmul.f32 1.442695, %v474_v60 }
 0x3a1   : > { %1017 = vpow2.f32 %v475_v61 }
 0x3a4   : > { %v588_v62 = vpop.xlane.xlu0 %587 }
 0x3a5   : > { %v589_v63 = vsub.f32 %v585_v49, %v588_v62 }
 0x3a7   : > { %v590_v1 = vmul.f32 1.442695, %v589_v63 }
 0x3a9   : > { %1019 = vpow2.f32 %v590_v1 }
 0x3ab   : > { %v1018_v2 = vpop.eup %1017 }
 0x3ac   : > { %v477_v3 = vsel %vm299_vm1, %v1018_v2, 0.0  ;;  %v700_v7 = vpop.xlane.xlu1 %699 }
 0x3ad   : > { %478 = vadd.xlane.f32.xlu1 %v477_v3  ;;  %v701_v8 = vsub.f32 %v697_v56, %v700_v7 }
 0x3af   : > { %v702_v9 = vmul.f32 1.442695, %v701_v8 }
 0x3b1   : > { %1021 = vpow2.f32 %v702_v9 }
 0x3b3   : > { %v1020_v4 = vpop.eup %1019 }
 0x3b4   : > { %v592_v6 = vsel %vm299_vm1, %v1020_v4, 0.0 }
 0x3b5   : > { %593 = vadd.xlane.f32.xlu0 %v592_v6 }
 0x3bb   : > { %v1022_v10 = vpop.eup %1021 }
 0x3bc   : > { %v704_v11 = vsel %vm299_vm1, %v1022_v10, 0.0 }
 0x3be   : > { %598 = vrot.lane.b32.xlu1 %v906_v5, %s1056_s30 }
 0x3cb   : > { %486 = vrot.lane.b32.xlu0 %v906_v5, %s1055_s29 }
 0x3e2   : > { %705 = vadd.xlane.f32.xlu1 %v704_v11 }
 0x3f3   : > { %710 = vrot.lane.b32.xlu1 %v906_v5, %s1057_s5 }
 0x43a   : > { %v479_v12 = vpop.xlane.xlu1 %478 }
 0x43b   : > { %1023 = vrcp.f32 %v479_v12 }
 0x43e   : > { %v599_v18 = vpop.permute.xlu1 %598 }
 0x43f   : > { %v604_v20 = vsel %vm369_vm2, %v599_v18, 0 }
 0x442   : > { %v594_v13 = vpop.xlane.xlu0 %593 }
 0x443   : > { %1025 = vrcp.f32 %v594_v13 }
 0x445   : > { %v1024_v14 = vpop.eup %1023 }
 0x446   : > { %v481_v15 = vmul.f32 %v1024_v14, %v1018_v2  ;;  %v487_v16 = vpop.permute.xlu0 %486 }
 0x447   : > { %v492_v17 = vsel %vm369_vm2, %v487_v16, 0 }
 0x448   : > { %949 = vmatpush3.bf16.msra.mxu0 %v492_v17  ;;  %v482_v19 = vpack.c.bf16 %v481_v15, %v481_v15 }
 0x449   : > { %960 = vmatprep.subr.bf16.mxu0 %v1053_v0 }
 0x44b   : > { %951 = vmatmul.mubr.msk.bf16.vlgmr.msra.gmra.mrb[4].mxu0 %vm299_vm1, %v482_v19 }
 0x44c   : > { %961 = vmatpush3.bf16.msra.mxu0 %v604_v20  ;;  %962 = vmatprep.mubr.msk.bf16.mxu0 %vm1054_vm0, %v1053_v0 }
 0x44d   : > { %v1026_v21 = vpop.eup %1025  ;;  %972 = vmatprep.subr.bf16.mxu0 %v1053_v0 }
 0x44e   : > { %v596_v22 = vmul.f32 %v1026_v21, %v1020_v4 }
 0x450   : > { %v597_v23 = vpack.c.bf16 %v596_v22, %v596_v22 }
 0x453   : > { %963 = vmatmul.mubr.msk.bf16.vlgmr.msra.gmra.mrb[8].mxu0 %vm299_vm1, %v597_v23 }
 0x454   : > { %974 = vmatprep.mubr.msk.bf16.mxu0 %vm1054_vm0, %v1053_v0 }
 0x46f   : > { %v706_v24 = vpop.xlane.xlu1 %705 }
 0x470   : > { %1027 = vrcp.f32 %v706_v24 }
 0x473   : > { %v711_v25 = vpop.permute.xlu1 %710 }
 0x474   : > { %v716_v26 = vsel %vm369_vm2, %v711_v25, 0 }
 0x475   : > { %973 = vmatpush3.bf16.msra.mxu0 %v716_v26 }
 0x47a   : > { %v1028_v27 = vpop.eup %1027 }
 0x47b   : > { %v708_v28 = vmul.f32 %v1028_v27, %v1022_v10 }
 0x47d   : > { %v709_v29 = vpack.c.bf16 %v708_v28, %v708_v28 }
 0x47f   : > { %975 = vmatmul.mubr.msk.bf16.vlgmr.msra.gmra.mrb[12].mxu0 %vm299_vm1, %v709_v29 }
 0x51e   : > { %v528_v30 = vpop.f32.mrb[4].mxu0 }
 0x51f   : > { %759 = vrot.lane.b32.xlu0 %v528_v30, %s1058_s9  ;;  %v952_v31 = vpop.f32.mrb[5].mxu0 }
 0x520   : > { %v531_v32 = vpop.f32.mrb[6].mxu0 }
 0x521   : > { %v953_v33 = vpop.f32.mrb[7].mxu0 }
 0x526   : > { %v640_v35 = vpop.f32.mrb[8].mxu0 }
 0x527   : > { %763 = vrot.lane.b32.xlu1 %v640_v35, %s1059_s10  ;;  %v964_v0 = vpop.f32.mrb[9].mxu0 }
 0x528   : > { %v643_v36 = vpop.f32.mrb[10].mxu0 }
 0x529   : > { %v965_v37 = vpop.f32.mrb[11].mxu0 }
 0x552   : > { %v752_v38 = vpop.f32.mrb[12].mxu0 }
 0x553   : > { %767 = vrot.lane.b32.xlu0 %v752_v38, %s1060_s11  ;;  %v976_v39 = vpop.f32.mrb[13].mxu0 }
 0x554   : > { %v755_v40 = vpop.f32.mrb[14].mxu0 }
 0x555   : > { %v977_v41 = vpop.f32.mrb[15].mxu0 }
 0x591   : > { %v760_v42 = vpop.permute.xlu0 %759 }
 0x592   : > { %v770_v44 = vsel %vm299_vm1, %v1163_v34, %v760_v42 }
 0x599   : > { %v764_v43 = vpop.permute.xlu1 %763 }
 0x59a   : > { %v772_v45 = vsel %vm771_vm3, %v770_v44, %v764_v43 }
 0x5c5   : > { %v768_v46 = vpop.permute.xlu0 %767 }
 0x5c6   : > { %v774_v47 = vsel %vm773_vm4, %v772_v45, %v768_v46 }
 0x5c7   : > { %v775_v48 = vpack.c.bf16 %v774_v47, %v774_v47 }
 0x5c9   : > { %777 = vst.msk [vmem:[%s293_s14] sm:$0xf] %vm776_vm5, %v775_v48 }
 0x5ca PF: > { %s14_s17 = sadd.s32 1, %s1051_s17   ;;  %s1211_s15 = smov %s1047_s16 }
 0x5cb   : > { %p11_p5 = scmp.ge.s32.totalorder %s14_s17, 4   ;;  %s1212_s16 = smov %s1214_s18 }
 0x5cd   :  { %13 = sbr.rel (!%p11_p5) target bundleno = 2 (0x2), region = 75 }

// kernel: encoder_forward.14
= control target key start
LH: loop header
LB: loop body
LE: loop exit
PB: predicated region body
PF: predicated region fallthrough
CT: control target
= control target key end

     0   :  { %v227_v0 = vmov 0.0   ;;  %vm228_vm0 = vmmov 0   ;;  %vm70_vm1 = vcmask 523264   ;;  %vm121_vm2 = vcmask 261120   ;;  %s301_s1 = inlined_call_operand.vmem [shape: bf16[64,32], index: 1, kind: input, shape index: {}]   ;;  %s302_s0 = inlined_call_operand.vmem [shape: bf16[16,64], index: 0, kind: input, shape index: {}]   ;;  %s303_s3 = inlined_call_operand.vmem [shape: bf16[16,32], index: 3, kind: input, shape index: {}]   ;;  %s304_s2 = inlined_call_operand.vmem [shape: f32[1,32], index: 2, kind: input, shape index: {}]   ;;  %s305_s4 = inlined_call_operand.vmem [shape: f32[1,32], index: 4, kind: input, shape index: {}]   ;;  %s306_s5 = inlined_call_operand.vmem [shape: f32[1,32], index: 5, kind: input, shape index: {}]   ;;  %s307_s6 = inlined_call_operand.vmem [shape: bf16[16,32], index: 6, kind: output, shape index: {}]  }
   0x1   :  { %204 = vmatprep.subr.bf16.mxu0 %v227_v0  ;;  %v218_v1 = vld [vmem:[%s301_s1] sm:$0xff]   ;;  %212 = vmatprep.mubr.msk.bf16.mxu0 %vm228_vm0, %v227_v0  ;;  %v219_v2 = vld [vmem:[%s301_s1 + $0x8] sm:$0xff]   ;;  %v220_v3 = vld [vmem:[%s301_s1 + $0x10] sm:$0xff]   ;;  %vm175_vm3 = vcmask 257024  }
   0x2   :  { %205 = vmatpush3.bf16.msra.mxu0 %v218_v1  ;;  %v221_v4 = vld [vmem:[%s301_s1 + $0x18] sm:$0xff]   ;;  %v222_v5 = vld [vmem:[%s302_s0] sm:$0xff]  }
   0x3   :  { %206 = vmatprep.subr.bf16.mxu0 %v227_v0  ;;  %v196_v6 = vld [vmem:[%s303_s3] sm:$0xff]  }
   0x4   :  { %v182_v7 = vld [vmem:[%s304_s2] ss:$0 sm:$0xff]  ;;  %v197_v8 = vunpack.c.l.bf16 %v196_v6  ;;  %v198_v12 = vunpack.c.h.bf16 %v196_v6 }
   0x5   :  { %v189_v37 = vld [vmem:[%s305_s4] ss:$0 sm:$0xff] }
   0x6   :  { %207 = vmatpush3.bf16.msra.mxu0 %v219_v2  ;;  %v190_v39 = vld [vmem:[%s306_s5] ss:$0 sm:$0xff] }
   0x7   :  { %208 = vmatprep.subr.bf16.mxu0 %v227_v0 }
   0xa   :  { %209 = vmatpush3.bf16.msra.mxu0 %v220_v3 }
   0xb   :  { %210 = vmatprep.subr.bf16.mxu0 %v227_v0 }
   0xe   :  { %211 = vmatpush3.bf16.msra.mxu0 %v221_v4 }
  0x11   :  { %213 = vmatmul.mubr.msk.bf16.vlgmr.msra.gmra.mrb[0].mxu0 %vm70_vm1, %v222_v5 }
  0xe4   :  { %v108_v9 = vpop.f32.mrb[0].mxu0 }
  0xe5   :  { %v109_v10 = vadd.f32 %v182_v7, %v108_v9  ;;  %v214_v11 = vpop.f32.mrb[1].mxu0 }
  0xe6   :  { %v111_v13 = vpop.f32.mrb[2].mxu0 }
  0xe7   :  { %v112_v14 = vadd.f32 %v182_v7, %v111_v13  ;;  %v215_v15 = vpop.f32.mrb[3].mxu0  ;;  %v119_v16 = vadd.f32 %v197_v8, %v109_v10 }
  0xe9   :  { %v122_v17 = vsel %vm121_vm2, %v119_v16, 0.0  ;;  %v120_v18 = vadd.f32 %v198_v12, %v112_v14 }
  0xea   :  { %123 = vadd.xlane.f32.xlu0 %v122_v17 }
  0xeb   :  { %v125_v19 = vsel %vm121_vm2, %v120_v18, 0.0 }
  0xee   :  { %126 = vadd.xlane.f32.xlu0 %v125_v19 }
 0x177   :  { %v124_v20 = vpop.xlane.xlu0 %123 }
 0x178   :  { %v129_v21 = vmul.f32 0.03125, %v124_v20 }
 0x17a   :  { %v131_v22 = vsub.f32 %v119_v16, %v129_v21 }
 0x17b   :  { %v127_v23 = vpop.xlane.xlu0 %126 }
 0x17c   :  { %v130_v24 = vmul.f32 0.03125, %v127_v23  ;;  %v133_v25 = vmul.f32 %v131_v22, %v131_v22 }
 0x17e   :  { %v132_v26 = vsub.f32 %v120_v18, %v130_v24  ;;  %v135_v27 = vsel %vm121_vm2, %v133_v25, 0.0 }
 0x17f   :  { %136 = vadd.xlane.f32.xlu1 %v135_v27 }
 0x180   :  { %v134_v28 = vmul.f32 %v132_v26, %v132_v26 }
 0x182   :  { %v138_v29 = vsel %vm121_vm2, %v134_v28, 0.0 }
 0x183   :  { %139 = vadd.xlane.f32.xlu1 %v138_v29 }
 0x20c   :  { %v137_v30 = vpop.xlane.xlu1 %136 }
 0x20d   :  { %v141_v31 = vmul.f32 0.03125, %v137_v30 }
 0x20f   :  { %v143_v32 = vadd.f32 1e-12, %v141_v31 }
 0x210   :  { %v140_v33 = vpop.xlane.xlu1 %139 }
 0x211   :  { %223 = vrsqrt.f32 %v143_v32  ;;  %v142_v34 = vmul.f32 0.03125, %v140_v33 }
 0x213   :  { %v144_v35 = vadd.f32 1e-12, %v142_v34 }
 0x215   :  { %225 = vrsqrt.f32 %v144_v35 }
 0x21b   :  { %v224_v36 = vpop.eup %223 }
 0x21c   :  { %v147_v38 = vmul.f32 %v224_v36, %v131_v22 }
 0x21e   :  { %v156_v40 = vmul.f32 %v189_v37, %v147_v38 }
 0x21f   :  { %v226_v41 = vpop.eup %225 }
 0x220   :  { %v165_v42 = vadd.f32 %v190_v39, %v156_v40  ;;  %v148_v43 = vmul.f32 %v226_v41, %v132_v26 }
 0x222   :  { %v193_v44 = vpack.c.bf16 %v165_v42, %v165_v42  ;;  %v157_v45 = vmul.f32 %v189_v37, %v148_v43 }
 0x224   :  { %176 = vst.msk [vmem:[%s307_s6] sm:$0xf] %vm175_vm3, %v193_v44  ;;  %v166_v46 = vadd.f32 %v190_v39, %v157_v45 }
 0x226   :  { %v194_v47 = vpack.c.bf16 %v166_v46, %v166_v46 }
 0x228   :  { %177 = vst.msk [vmem:[%s307_s6 + $0x4] sm:$0xf] %vm175_vm3, %v194_v47 }

</bundles_post_ra>
